<compile_context>
chip_gen: v5e
topology: v5e:2x2
jax: 0.10.0
libtpu: 0.0.40
codegen_flags: <defaults>
</compile_context>

<pallas_src>
import numpy as np
import jax
import jax.numpy as jnp
from jax.experimental import pallas as pl
from jax.experimental.pallas import tpu as pltpu

_LANES = 128
_SUBLANES = 8
# EMA block = (_MAX_TILE_R, 128) f32 = 1 MiB.  Three pipelined arrays x 2
# buffers = 6 MiB of VMEM: fits v5e's 16 MiB scoped default and v7x's 32 MiB
# scoped default with headroom, while being big enough (>=512 rows) that the
# kernel sits at the HBM roofline instead of paying ~0.35us/step overhead on
# tiny one-vreg (8x128) tiles.
_MAX_TILE_R = 2048


# ----------------------------------------------------------------------------
# Pallas kernel 1: EMA update  (target = target * decay + source * (1 - decay))
# ----------------------------------------------------------------------------
def _ema_update_kernel(decay_ref, tgt_ref, src_ref, out_ref):
    d = decay_ref[0]                       # scalar decay from SMEM
    out_ref[...] = tgt_ref[...] * d + src_ref[...] * (1.0 - d)


def _pack_params(params, keys):
    """Flatten + concat params into an f32 (R, 128) slab with R % tile_r == 0."""
    flats = [jnp.ravel(params[k]).astype(jnp.float32) for k in keys]
    flat = jnp.concatenate(flats)
    n = flat.shape[0]
    rows = -(-n // _LANES)
    if rows <= _MAX_TILE_R:
        rows = -(-rows // _SUBLANES) * _SUBLANES        # single grid step
    else:
        rows = -(-rows // _MAX_TILE_R) * _MAX_TILE_R    # whole number of tiles
    flat = jnp.pad(flat, (0, rows * _LANES - n))
    return flat.reshape(rows, _LANES)


def _unpack_params(slab, keys, templates):
    """Slice the packed slab back into per-parameter arrays (forward only)."""
    flat = slab.reshape(-1)
    out = {}
    off = 0
    for k in keys:
        shape, dtype = templates[k]
        sz = int(np.prod(shape))
        out[k] = flat[off:off + sz].reshape(shape).astype(dtype)
        off += sz
    return out


def _ema_update_slab_impl(decay_arr, tgt_slab, src_slab):
    R = tgt_slab.shape[0]
    tile_r = min(R, _MAX_TILE_R)
    return pl.pallas_call(
        _ema_update_kernel,
        out_shape=jax.ShapeDtypeStruct((R, _LANES), jnp.float32),
        grid=(R // tile_r,),
        in_specs=[
            pl.BlockSpec(memory_space=pltpu.MemorySpace.SMEM),   # decay scalar
            pl.BlockSpec((tile_r, _LANES), lambda i: (i, 0)),    # target slab
            pl.BlockSpec((tile_r, _LANES), lambda i: (i, 0)),    # source slab
        ],
        out_specs=pl.BlockSpec((tile_r, _LANES), lambda i: (i, 0)),
        # Write the EMA result back into the target slab's buffer (in-place).
        input_output_aliases={1: 0},
        compiler_params=pltpu.CompilerParams(
            dimension_semantics=("parallel",)),
    )(decay_arr, tgt_slab, src_slab)


# Donate the target slab so the aliased update is truly in-place under jit.
_ema_update_slab = jax.jit(_ema_update_slab_impl, donate_argnums=(1,))


# ----------------------------------------------------------------------------
# Pallas kernel 2: forward of the (synthetic) target model: 1x1 Conv2d + bias
# ----------------------------------------------------------------------------
def _conv1x1_kernel(w_ref, b_ref, x_ref, o_ref):
    # w_ref: (Cout, Cin), b_ref: (Cout, 1), x_ref: (1, Cin, HW)
    # Channels are the contraction dim; H*W sits on the lane axis so the output
    # store is lane-dense (no masked partial stores for tiny Cout).
    acc = jnp.dot(w_ref[...], x_ref[0], preferred_element_type=jnp.float32)
    o_ref[0] = (acc + b_ref[...]).astype(o_ref.dtype)


def _conv1x1_impl(x_nchw, w2, b2):
    N, Cin, H, W = x_nchw.shape
    Cout = w2.shape[0]
    HW = H * W
    # NCHW -> (N, Cin, H*W) is a contiguous reshape: no transpose, no extra
    # HBM pass; the reverse reshape on the output is likewise free.
    x3 = x_nchw.reshape(N, Cin, HW).astype(jnp.float32)
    # TODO(synk): for very large H*W, add an HW tiling axis to the grid.
    y3 = pl.pallas_call(
        _conv1x1_kernel,
        out_shape=jax.ShapeDtypeStruct((N, Cout, HW), jnp.float32),
        grid=(N,),
        in_specs=[
            pl.BlockSpec((Cout, Cin), lambda n: (0, 0)),      # weights (resident)
            pl.BlockSpec((Cout, 1), lambda n: (0, 0)),        # bias (resident)
            pl.BlockSpec((1, Cin, HW), lambda n: (n, 0, 0)),  # one image per step
        ],
        out_specs=pl.BlockSpec((1, Cout, HW), lambda n: (n, 0, 0)),
        compiler_params=pltpu.CompilerParams(
            dimension_semantics=("parallel",)),   # v7x: shard batch over 2 TCs
    )(w2, b2, x3)
    return y3.reshape(N, Cout, H, W)


_conv1x1_call = jax.jit(_conv1x1_impl)


def conv1x1_forward(x_nchw, weight, bias):
    """x_nchw: (N, C, H, W); weight: (Cout, Cin, 1, 1); bias: (Cout,)."""
    w2 = weight[:, :, 0, 0].astype(jnp.float32)       # (Cout, Cin)
    b2 = bias.reshape(-1, 1).astype(jnp.float32)      # (Cout, 1)
    return _conv1x1_call(x_nchw, w2, b2)


# ----------------------------------------------------------------------------
# EMA wrapper (mirrors the PyTorch module)
# ----------------------------------------------------------------------------
class EMA:
    def __init__(self, source_params, decay=0.9999, start_itr=0):
        self.source = source_params
        self.decay = decay
        self.start_itr = start_itr
        self._keys = sorted(source_params)
        self._templates = {
            k: (tuple(source_params[k].shape), source_params[k].dtype)
            for k in self._keys
        }
        # "Initializing EMA parameters to be source parameters..."
        # Persistent f32 EMA state: packed once, never re-packed per update and
        # never cast back to a lower-precision param dtype between updates.
        self.target_slab = _pack_params(source_params, self._keys)

    @property
    def target(self):
        # Unpack only when individual tensors are actually needed (forward).
        return _unpack_params(self.target_slab, self._keys, self._templates)

    def update(self, itr=None):
        # Mirrors the PyTorch quirk: `if itr and itr < self.start_itr` is falsy
        # for itr == 0, so iteration 0 uses self.decay even if start_itr > 0.
        if itr and itr < self.start_itr:
            decay = 0.0
        else:
            decay = self.decay
        src_slab = _pack_params(self.source, self._keys)
        decay_arr = jnp.asarray([decay], dtype=jnp.float32)
        self.target_slab = _ema_update_slab(decay_arr, self.target_slab, src_slab)

    def forward(self, x):
        # forward == target model forward (synthetic 1x1 conv target)
        p = self.target
        return conv1x1_forward(x, p["weight"], p["bias"])


# ----------------------------------------------------------------------------
if __name__ == "__main__":
    key = jax.random.PRNGKey(0)
    N, C, H, W = 2, 4, 16, 16

    k_w, k_b, k_x, k_d = jax.random.split(key, 4)
    # Deterministic synthetic source model params: Conv2d(C, C, kernel_size=1)
    src_params = {
        "weight": jax.random.normal(k_w, (C, C, 1, 1), dtype=jnp.float32) * 0.1,
        "bias":   jax.random.normal(k_b, (C,), dtype=jnp.float32) * 0.1,
    }

    ema = EMA(src_params, decay=0.9999, start_itr=0)

    # Simulate the source model taking a training step, then run the EMA update.
    old_target = {k: np.array(v) for k, v in ema.target.items()}
    ema.source = {
        "weight": src_params["weight"]
                  + jax.random.normal(k_d, (C, C, 1, 1), dtype=jnp.float32) * 0.01,
        "bias":   src_params["bias"] + 0.01,
    }
    ema.update(itr=10)
    jax.block_until_ready(ema.target_slab)

    # Reference check for the EMA update kernel.
    d = 0.9999
    new_target = ema.target
    for k in src_params:
        ref = old_target[k] * d + np.array(ema.source[k]) * (1.0 - d)
        assert np.allclose(np.array(new_target[k]), ref, atol=1e-6), f"EMA mismatch on {k}"

    # Forward pass through the (EMA) target model.
    x = jax.random.normal(k_x, (N, C, H, W), dtype=jnp.float32)
    y = ema.forward(x)
    y = jax.block_until_ready(y)

    # Reference check for the forward (1x1 conv, NCHW).
    w2d = np.array(new_target["weight"])[:, :, 0, 0]
    ref_y = np.einsum("oi,nihw->nohw", w2d, np.array(x)) \
            + np.array(new_target["bias"])[None, :, None, None]
    assert y.shape == (N, C, H, W)
    assert np.allclose(np.array(y), ref_y, atol=1e-4), "forward mismatch"

    print("KERNEL_OK")
</pallas_src>

<mosaic_0001>
module attributes {stable_mosaic.version = 11 : i64} {
  func.func @_ema_update_kernel(%arg0: i32, %arg1: memref<1xf32, #tpu.memory_space<smem>>, %arg2: memref<8x128xf32, #tpu.memory_space<vmem>>, %arg3: memref<8x128xf32, #tpu.memory_space<vmem>>, %arg4: memref<8x128xf32, #tpu.memory_space<vmem>>) attributes {dimension_semantics = [#tpu.dimension_semantics<parallel>], iteration_bounds = array<i64: 1>, scalar_prefetch = 0 : i64, scratch_operands = 0 : i64, tpu.core_type = #tpu.core_type<tc>, window_params = [{transform_indices = @transform_0, window_bounds = array<i64: 1>}, {transform_indices = @transform_1, window_bounds = array<i64: 8, 128>}, {transform_indices = @transform_2, window_bounds = array<i64: 8, 128>}, {transform_indices = @transform_3, window_bounds = array<i64: 8, 128>}]} {
    %c0 = arith.constant 0 : index
    %0 = memref.load %arg1[%c0] : memref<1xf32, #tpu.memory_space<smem>>
    %c0_0 = arith.constant 0 : index
    %c0_1 = arith.constant 0 : index
    %1 = vector.load %arg2[%c0_0, %c0_1] : memref<8x128xf32, #tpu.memory_space<vmem>>, vector<8x128xf32>
    %2 = vector.broadcast %0 : f32 to vector<8x128xf32>
    %3 = arith.mulf %1, %2 : vector<8x128xf32>
    %c0_2 = arith.constant 0 : index
    %c0_3 = arith.constant 0 : index
    %4 = vector.load %arg3[%c0_2, %c0_3] : memref<8x128xf32, #tpu.memory_space<vmem>>, vector<8x128xf32>
    %cst = arith.constant 1.000000e+00 : f32
    %5 = arith.subf %cst, %0 : f32
    %6 = vector.broadcast %5 : f32 to vector<8x128xf32>
    %7 = arith.mulf %4, %6 : vector<8x128xf32>
    %8 = arith.addf %3, %7 : vector<8x128xf32>
    %c0_4 = arith.constant 0 : index
    %c0_5 = arith.constant 0 : index
    %9 = vector.load %arg4[%c0_4, %c0_5] : memref<8x128xf32, #tpu.memory_space<vmem>>, vector<8x128xf32>
    tpu.vector_store %arg4[%c0_4, %c0_5], %8 {strides = array<i32>} : memref<8x128xf32, #tpu.memory_space<vmem>>, vector<8x128xf32>,
    return
  }
  func.func @transform_0(%arg0: i32) -> i32 {
    %c0_i32 = arith.constant 0 : i32
    %c0_i32_0 = arith.constant 0 : i32
    return %c0_i32 : i32
  }
  func.func @transform_1(%arg0: i32) -> (i32, i32) {
    %c0_i32 = arith.constant 0 : i32
    %c0_i32_0 = arith.constant 0 : i32
    return %arg0, %c0_i32 : i32, i32
  }
  func.func @transform_2(%arg0: i32) -> (i32, i32) {
    %c0_i32 = arith.constant 0 : i32
    %c0_i32_0 = arith.constant 0 : i32
    return %arg0, %c0_i32 : i32, i32
  }
  func.func @transform_3(%arg0: i32) -> (i32, i32) {
    %c0_i32 = arith.constant 0 : i32
    %c0_i32_0 = arith.constant 0 : i32
    return %arg0, %c0_i32 : i32, i32
  }
}

</mosaic_0001>

<bundles_post_ra>
// kernel: _ema_update_slab_impl.1
= control target key start
LH: loop header
LB: loop body
LE: loop exit
PB: predicated region body
PF: predicated region fallthrough
CT: control target
= control target key end

     0   :  { %9 = vsyncpa [#allocation4], 0  ;;  %s191_s0 = inlined_call_operand.<no memory space> [shape: f32[1], index: 0, kind: input, shape index: {}]   ;;  %s192_s1 = inlined_call_operand.hbm [shape: f32[8,128], index: 1, kind: input, shape index: {}, may-alias: {1,3}]   ;;  %s193_s2 = inlined_call_operand.hbm [shape: f32[8,128], index: 2, kind: input, shape index: {}]   ;;  %s194_s3 = inlined_call_operand.hbm [shape: f32[8,128], index: 3, kind: output, shape index: {}, may-alias: {1,3}]  }
   0x1   :  { %10 = vsyncpa [#allocation7], 0 }
   0x2   :  { %11 = vsyncpa [#allocation5], 0  ;;  %s19_s14 = sshll.u32 %s192_s1, 4  ;;  %s153_s15 = smov [#allocation3]   ;;  %s20_s14 = int_to_ptr.hbm [resolvable:$true] %s19_s14 }
   0x3   :  { %s21_s16 = sshll.u32 %s153_s15, 4  ;;  %s30_s19 = sshll.u32 %s193_s2, 4  ;;  %s22_s16 = int_to_ptr.vmem [resolvable:$true] %s21_s16  ;;  %s31_s19 = int_to_ptr.hbm [resolvable:$true] %s30_s19 }
   0x4   :  { %24 = dma.hbm_to_vmem [thread:$0]  %s20_s14, 128, %s22_s16, [#allocation4]  }
   0x5   :  { %s154_s20 = smov [#allocation6]  }
   0x6   :  { %s32_s21 = sshll.u32 %s154_s20, 4  ;;  %s33_s21 = int_to_ptr.vmem [resolvable:$true] %s32_s21 }
   0x7   :  { %35 = dma.hbm_to_vmem [thread:$0]  %s31_s19, 128, %s33_s21, [#allocation7]  }
   0x8   :  { %147 = dma.done.wait [#allocation4], 128  }
   0x9   :  { %148 = vsyncadd [#allocation4], 4294967168 }
   0xa   :  { %149 = dma.done.wait [#allocation7], 128  }
   0xb   :  { %150 = vsyncadd [#allocation7], 4294967168  ;;  %s49_s23 = ssub.f32 1.0, %s191_s0  ;;  %v46_v0 = vstv %s191_s0  ;;  %v45_v2 = vld [vmem:[#allocation3] sm:$0xff]  ;;  %v48_v3 = vld [vmem:[#allocation6] sm:$0xff]  ;;  %s155_s2 = smov [#allocation8]  }
   0xc   :  { %s59_s26 = sshll.u32 %s155_s2, 4  ;;  %s61_s29 = sshll.u32 %s194_s3, 4  ;;  %v47_v4 = vmul.f32 %v46_v0, %v45_v2  ;;  %s60_s26 = int_to_ptr.vmem [resolvable:$true] %s59_s26  ;;  %s62_s29 = int_to_ptr.hbm [resolvable:$true] %s61_s29 }
   0xd   :  { %v50_v1 = vstv %s49_s23 }
   0xe   :  { %v51_v5 = vmul.f32 %v50_v1, %v48_v3 }
  0x10   :  { %v52_v6 = vadd.f32 %v51_v5, %v47_v4 }
  0x12   :  { %53 = vst [vmem:[#allocation8] sm:$0xff] %v52_v6 }
  0x13   :  { %64 = dma.vmem_to_hbm [thread:$0]  %s60_s26, 128, %s62_s29, [#allocation5]  }
  0x14   :  { %151 = dma.done.wait [#allocation5], 128  }
  0x15   :  { %152 = vsyncadd [#allocation5], 4294967168 }
  0x16   :  { %69 = vsyncpa [#allocation4], 1 }
  0x17   :  { %70 = vsyncpa [#allocation7], 1 }
  0x18   :  { %71 = vsyncpa [#allocation5], 1 }

</bundles_post_ra>
